<compile_context>
chip_gen: v7x
topology: tpu7x:2x2x1
jax: 0.10.0
libtpu: 0.0.40
codegen_flags: <defaults>
</compile_context>

<pallas_src>
import jax
import jax.numpy as jnp
from jax.experimental import pallas as pl
from jax.experimental.pallas import tpu as pltpu


_LANES = 512                            # lane-dense last dim (multiple of 128)
_TARGET_BLOCK_BYTES = 2 * 1024 * 1024   # per streaming input, per pipeline buffer
_VMEM_LIMIT_BYTES = 32 * 1024 * 1024    # 2 inputs x 2 buffers x 2 MiB + headroom


# ---------------------------------------------------------------------------
# MSE (sum of squared errors) streaming kernel
# ---------------------------------------------------------------------------
def _make_mse_kernel(rows, block_rows, needs_mask):
    def kernel(rx_ref, x_ref, out_ref):
        # Cast per-tile inside the kernel (hidden under the HBM-bound DMA).
        d = rx_ref[...].astype(jnp.float32) - x_ref[...].astype(jnp.float32)
        d2 = d * d
        if needs_mask:
            # The last grid step reads past `rows`; zero those unspecified rows.
            valid = rows - pl.program_id(0) * block_rows
            row_ids = jax.lax.broadcasted_iota(jnp.int32, d2.shape, 0)
            d2 = jnp.where(row_ids < valid, d2, 0.0)
        # Sublane-only reduce -> (1, LANES) lane partial; lanes summed in wrapper.
        out_ref[0] = jnp.sum(d2, axis=0, keepdims=True)
    return kernel


def _mse_sum(recon_x, x):
    """Sum of squared errors over all elements (unscaled)."""
    total = recon_x.size
    rx_flat = recon_x.reshape(-1)
    x_flat = x.reshape(-1)

    rows = total // _LANES
    lane_tail = total - rows * _LANES

    # Sub-512-element ragged tail (rare for image tensors): plain XLA.
    tail_sse = None
    if lane_tail:
        rt = rx_flat[rows * _LANES:].astype(jnp.float32)
        xt = x_flat[rows * _LANES:].astype(jnp.float32)
        tail_sse = jnp.sum((rt - xt) ** 2)

    if rows == 0:
        # Entire tensor is smaller than one lane row; XLA handles it.
        return tail_sse

    if lane_tail:
        # NOTE: only hit when total % 512 != 0; the prefix slice may cost one
        # extra copy, still cheaper/equal to the old full-tensor jnp.pad.
        rx2 = rx_flat[: rows * _LANES].reshape(rows, _LANES)
        x2 = x_flat[: rows * _LANES].reshape(rows, _LANES)
    else:
        rx2 = rx_flat.reshape(rows, _LANES)   # free bitcast of contiguous data
        x2 = x_flat.reshape(rows, _LANES)

    # ~2 MiB of input-dtype bytes per block per buffer: 1024 rows f32 / 2048 bf16.
    itemsize = jnp.dtype(recon_x.dtype).itemsize
    max_rows = max(8, _TARGET_BLOCK_BYTES // (_LANES * itemsize))
    if rows <= max_rows:
        block_rows = rows                     # full-extent block, always legal
    else:
        block_rows = max_rows                 # multiple of 8
    num_blocks = pl.cdiv(rows, block_rows)
    needs_mask = (rows % block_rows) != 0

    partials = pl.pallas_call(
        _make_mse_kernel(rows, block_rows, needs_mask),
        grid=(num_blocks,),
        out_shape=jax.ShapeDtypeStruct((num_blocks, 1, _LANES), jnp.float32),
        in_specs=[
            pl.BlockSpec((block_rows, _LANES), lambda i: (i, 0)),   # recon_x
            pl.BlockSpec((block_rows, _LANES), lambda i: (i, 0)),   # x
        ],
        out_specs=pl.BlockSpec((1, 1, _LANES), lambda i: (i, 0, 0)),
        compiler_params=pltpu.CompilerParams(
            # "parallel" lets the grid shard across v7x's two TensorCores;
            # per-block outputs keep it race-free.
            # TODO(synk): verify 2-TC sharding in an xprof trace on v7x and
            # switch to pltpu.CORE_PARALLEL if plain "parallel" does not shard.
            dimension_semantics=("parallel",),
            vmem_limit_bytes=_VMEM_LIMIT_BYTES,
        ),
    )(rx2, x2)

    sse = jnp.sum(partials)
    if tail_sse is not None:
        sse = sse + tail_sse
    return sse


# ---------------------------------------------------------------------------
# KL term: tiny, hoisted into its own single-step pallas_call
# ---------------------------------------------------------------------------
def _kl_kernel(mu_ref, lv_ref, out_ref):
    mu = mu_ref[...].astype(jnp.float32)
    lv = lv_ref[...].astype(jnp.float32)
    kld = -0.5 * jnp.sum(1.0 + lv - mu * mu - jnp.exp(lv))
    out_ref[...] = jnp.full(out_ref.shape, kld, dtype=jnp.float32)


def _kl_loss(mu, log_var):
    mu2 = mu.reshape(1, -1)
    lv2 = log_var.reshape(1, -1)
    out = pl.pallas_call(
        _kl_kernel,
        grid=(1,),
        out_shape=jax.ShapeDtypeStruct((1, 128), jnp.float32),
        in_specs=[
            pl.BlockSpec(mu2.shape, lambda i: (0, 0)),
            pl.BlockSpec(lv2.shape, lambda i: (0, 0)),
        ],
        out_specs=pl.BlockSpec((1, 128), lambda i: (0, 0)),
    )(mu2, lv2)
    return out[0, 0]


# ---------------------------------------------------------------------------
# Public wrapper (matches VAE_Loss.forward semantics)
# ---------------------------------------------------------------------------
def vae_loss(mu, log_var, recon_x, x):
    """Returns (KLD, BCE): KLD = -0.5*sum(1+logvar-mu^2-exp(logvar)),
    BCE = mean((recon_x - x)^2) (torch MSELoss default reduction='mean')."""
    kld = _kl_loss(mu, log_var)
    bce = _mse_sum(recon_x, x) * (1.0 / float(recon_x.size))
    return kld, bce


def _reference(mu, log_var, recon_x, x):
    kld = -0.5 * jnp.sum(1.0 + log_var - mu ** 2 - jnp.exp(log_var))
    bce = jnp.mean((recon_x - x) ** 2)
    return kld, bce


if __name__ == "__main__":
    key = jax.random.PRNGKey(0)
    k1, k2, k3, k4 = jax.random.split(key, 4)

    B, C, H, W = 2, 4, 16, 16   # image shapes (NCHW, as PyTorch would feed)
    latent = 32                 # latent dimension for mu / log_var

    mu = jax.random.normal(k1, (B, latent), dtype=jnp.float32)
    log_var = 0.1 * jax.random.normal(k2, (B, latent), dtype=jnp.float32)

    loss_fn = jax.jit(vae_loss)

    def check(recon_x, x, rtol):
        kld, bce = loss_fn(mu, log_var, recon_x, x)
        jax.block_until_ready((kld, bce))
        kld_ref, bce_ref = _reference(mu, log_var, recon_x, x)
        assert jnp.allclose(kld, kld_ref, rtol=rtol, atol=1e-5), (kld, kld_ref)
        assert jnp.allclose(bce, bce_ref, rtol=rtol, atol=1e-6), (bce, bce_ref)

    # 1) Primary small image-shaped case (lane-divisible, single block).
    x1 = jax.random.normal(k3, (B, C, H, W), dtype=jnp.float32)
    r1 = x1 + 0.05 * jax.random.normal(k4, (B, C, H, W), dtype=jnp.float32)
    check(r1, x1, rtol=1e-5)

    # 2) Ragged lane tail (total % 512 != 0) -> wrapper XLA tail path.
    x2 = jax.random.normal(k3, (3, 3, 33, 17), dtype=jnp.float32)
    r2 = x2 + 0.05 * jax.random.normal(k4, (3, 3, 33, 17), dtype=jnp.float32)
    check(r2, x2, rtol=1e-4)

    # 3) Multi-block grid with a partial last block -> in-kernel row mask.
    x3 = jax.random.normal(k3, (1500, 512), dtype=jnp.float32)
    r3 = x3 + 0.05 * jax.random.normal(k4, (1500, 512), dtype=jnp.float32)
    check(r3, x3, rtol=1e-4)

    print("KERNEL_OK")
</pallas_src>

<mosaic_0001>
module attributes {stable_mosaic.version = 11 : i64} {
  func.func @kernel(%arg0: i32, %arg1: memref<4x512xf32, #tpu.memory_space<vmem>>, %arg2: memref<4x512xf32, #tpu.memory_space<vmem>>, %arg3: memref<1x1x512xf32, #tpu.memory_space<vmem>>) attributes {dimension_semantics = [#tpu.dimension_semantics<parallel>], iteration_bounds = array<i64: 1>, scalar_prefetch = 0 : i64, scratch_operands = 0 : i64, tpu.core_type = #tpu.core_type<tc>, window_params = [{transform_indices = @transform_0, window_bounds = array<i64: 4, 512>}, {transform_indices = @transform_1, window_bounds = array<i64: 4, 512>}, {transform_indices = @transform_2, window_bounds = array<i64: 1, 1, 512>}]} {
    %c0 = arith.constant 0 : index
    %c0_0 = arith.constant 0 : index
    %0 = vector.load %arg1[%c0, %c0_0] : memref<4x512xf32, #tpu.memory_space<vmem>>, vector<4x512xf32>
    %c0_1 = arith.constant 0 : index
    %c0_2 = arith.constant 0 : index
    %1 = vector.load %arg2[%c0_1, %c0_2] : memref<4x512xf32, #tpu.memory_space<vmem>>, vector<4x512xf32>
    %2 = arith.subf %0, %1 : vector<4x512xf32>
    %3 = arith.mulf %2, %2 : vector<4x512xf32>
    %cst = arith.constant dense<0.000000e+00> : vector<512xf32>
    %4 = vector.multi_reduction <add>, %3, %cst [0] : vector<4x512xf32> to vector<512xf32>
    %5 = vector.shape_cast %4 : vector<512xf32> to vector<1x512xf32>
    %c0_3 = arith.constant 0 : index
    %c0_4 = arith.constant 0 : index
    %c0_5 = arith.constant 0 : index
    %6 = vector.load %arg3[%c0_3, %c0_4, %c0_5] : memref<1x1x512xf32, #tpu.memory_space<vmem>>, vector<1x1x512xf32>
    %7 = vector.shape_cast %6 : vector<1x1x512xf32> to vector<1x512xf32>
    %8 = vector.shape_cast %5 : vector<1x512xf32> to vector<1x1x512xf32>
    tpu.vector_store %arg3[%c0_3, %c0_4, %c0_5], %8 {strides = array<i32>} : memref<1x1x512xf32, #tpu.memory_space<vmem>>, vector<1x1x512xf32>,
    return
  }
  func.func @transform_0(%arg0: i32) -> (i32, i32) {
    %c0_i32 = arith.constant 0 : i32
    %c0_i32_0 = arith.constant 0 : i32
    return %arg0, %c0_i32 : i32, i32
  }
  func.func @transform_1(%arg0: i32) -> (i32, i32) {
    %c0_i32 = arith.constant 0 : i32
    %c0_i32_0 = arith.constant 0 : i32
    return %arg0, %c0_i32 : i32, i32
  }
  func.func @transform_2(%arg0: i32) -> (i32, i32, i32) {
    %c0_i32 = arith.constant 0 : i32
    %c0_i32_0 = arith.constant 0 : i32
    %c0_i32_1 = arith.constant 0 : i32
    return %arg0, %c0_i32, %c0_i32_0 : i32, i32, i32
  }
}

module attributes {stable_mosaic.version = 11 : i64} {
  func.func @_kl_kernel(%arg0: i32, %arg1: memref<1x64xf32, #tpu.memory_space<vmem>>, %arg2: memref<1x64xf32, #tpu.memory_space<vmem>>, %arg3: memref<1x128xf32, #tpu.memory_space<vmem>>) attributes {dimension_semantics = [#tpu.dimension_semantics<arbitrary>], iteration_bounds = array<i64: 1>, scalar_prefetch = 0 : i64, scratch_operands = 0 : i64, tpu.core_type = #tpu.core_type<tc>, window_params = [{pipeline_mode = #tpu.pipeline_mode<synchronous>, transform_indices = @transform_0, window_bounds = array<i64: 1, 64>}, {pipeline_mode = #tpu.pipeline_mode<synchronous>, transform_indices = @transform_1, window_bounds = array<i64: 1, 64>}, {pipeline_mode = #tpu.pipeline_mode<synchronous>, transform_indices = @transform_2, window_bounds = array<i64: 1, 128>}]} {
    %c0 = arith.constant 0 : index
    %c0_0 = arith.constant 0 : index
    %0 = vector.load %arg1[%c0, %c0_0] : memref<1x64xf32, #tpu.memory_space<vmem>>, vector<1x64xf32>
    %c0_1 = arith.constant 0 : index
    %c0_2 = arith.constant 0 : index
    %1 = vector.load %arg2[%c0_1, %c0_2] : memref<1x64xf32, #tpu.memory_space<vmem>>, vector<1x64xf32>
    %cst = arith.constant 1.000000e+00 : f32
    %2 = vector.broadcast %cst : f32 to vector<1x64xf32>
    %3 = arith.addf %2, %1 : vector<1x64xf32>
    %4 = arith.mulf %0, %0 : vector<1x64xf32>
    %5 = arith.subf %3, %4 : vector<1x64xf32>
    %6 = math.exp %1 : vector<1x64xf32>
    %7 = arith.subf %5, %6 : vector<1x64xf32>
    %8 = vector.shape_cast %7 : vector<1x64xf32> to vector<1x1x64xf32>
    %cst_3 = arith.constant dense<0.000000e+00> : vector<1xf32>
    %9 = vector.multi_reduction <add>, %8, %cst_3 [1, 2] : vector<1x1x64xf32> to vector<1xf32>
    %10 = vector.shape_cast %9 : vector<1xf32> to vector<1x1x1xf32>
    %11 = vector.extract %10[0, 0, 0] : f32 from vector<1x1x1xf32>
    %cst_4 = arith.constant -5.000000e-01 : f32
    %12 = arith.mulf %cst_4, %11 : f32
    %13 = vector.broadcast %12 : f32 to vector<1x128xf32>
    %c0_5 = arith.constant 0 : index
    %c0_6 = arith.constant 0 : index
    %14 = vector.load %arg3[%c0_5, %c0_6] : memref<1x128xf32, #tpu.memory_space<vmem>>, vector<1x128xf32>
    tpu.vector_store %arg3[%c0_5, %c0_6], %13 {strides = array<i32>} : memref<1x128xf32, #tpu.memory_space<vmem>>, vector<1x128xf32>,
    return
  }
  func.func @transform_0(%arg0: i32) -> (i32, i32) {
    %c0_i32 = arith.constant 0 : i32
    %c0_i32_0 = arith.constant 0 : i32
    %c0_i32_1 = arith.constant 0 : i32
    return %c0_i32, %c0_i32_0 : i32, i32
  }
  func.func @transform_1(%arg0: i32) -> (i32, i32) {
    %c0_i32 = arith.constant 0 : i32
    %c0_i32_0 = arith.constant 0 : i32
    %c0_i32_1 = arith.constant 0 : i32
    return %c0_i32, %c0_i32_0 : i32, i32
  }
  func.func @transform_2(%arg0: i32) -> (i32, i32) {
    %c0_i32 = arith.constant 0 : i32
    %c0_i32_0 = arith.constant 0 : i32
    %c0_i32_1 = arith.constant 0 : i32
    return %c0_i32, %c0_i32_0 : i32, i32
  }
}

</mosaic_0001>

<bundles_post_ra>
// kernel: vae_loss.3
= control target key start
LH: loop header
LB: loop body
LE: loop exit
PB: predicated region body
PF: predicated region fallthrough
CT: control target
= control target key end

     0   :  { %vm25_vm0 = vcmask 1043456   ;;  %v93_v22 = vmov 1966171168   ;;  %v63_v24 = vlaneseq  ;;  %s124_s0 = inlined_call_operand.vmem [shape: f32[4,512], index: 0, kind: input, shape index: {}]   ;;  %s125_s1 = inlined_call_operand.vmem [shape: f32[4,512], index: 1, kind: input, shape index: {}]   ;;  %s126_s2 = inlined_call_operand.vmem [shape: f32[1,1,512], index: 2, kind: output, shape index: {}]  }
   0x1   :  { %v11_v0 = vld [vmem:[%s124_s0] sm:$0xff]  ;;  %v12_v1 = vld [vmem:[%s124_s0 + $0x8] sm:$0xff]  ;;  %v61_v23 = vunpack.c.l.s4 %v93_v22 }
   0x2   :  { %v13_v2 = vld [vmem:[%s125_s1] sm:$0xff]  ;;  %v14_v3 = vld [vmem:[%s125_s1 + $0x8] sm:$0xff]  ;;  %v64_v34 = vshrl.u32 %v63_v24, 7  ;;  %vm85_vm1 = vcmp.lt.s32.totalorder %v63_v24, 512 }
   0x3   :  { %v15_v4 = vsub.f32 %v11_v0, %v13_v2  ;;  %v16_v5 = vsub.f32 %v12_v1, %v14_v3  ;;  %v62_v33 = vunpack.c.0.s8 %v61_v23 }
   0x5   :  { %v17_v6 = vmul.f32 %v15_v4, %v15_v4  ;;  %v18_v7 = vmul.f32 %v16_v5, %v16_v5  ;;  %v65_v42 = vsub.s32 %v62_v33, %v64_v34 }
   0x7   :  { %v21_v8 = vcombine.high %v17_v6, %v17_v6  ;;  %v26_v9 = vsel %vm25_vm0, %v17_v6, 0.0  ;;  %v22_v10 = vcombine.high %v18_v7, %v18_v7  ;;  %v40_v12 = vsel %vm25_vm0, %v18_v7, 0.0 }
   0x8   :  { %v27_v11 = vrot.slane %v26_v9, 4  ;;  %v41_v14 = vrot.slane %v40_v12, 4 }
   0x9   :  { %v33_v13 = vsel %vm25_vm0, %v21_v8, 0.0  ;;  %v47_v17 = vsel %vm25_vm0, %v22_v10, 0.0 }
   0xa   :  { %v28_v15 = vadd.f32 %v27_v11, %v26_v9  ;;  %v34_v16 = vrot.slane %v33_v13, 4  ;;  %v42_v18 = vadd.f32 %v41_v14, %v40_v12  ;;  %v48_v19 = vrot.slane %v47_v17, 4 }
   0xc   :  { %v29_v20 = vrot.slane %v28_v15, 2  ;;  %v35_v21 = vadd.f32 %v34_v16, %v33_v13  ;;  %v43_v25 = vrot.slane %v42_v18, 2  ;;  %v49_v26 = vadd.f32 %v48_v19, %v47_v17 }
   0xe   :  { %v30_v27 = vadd.f32 %v29_v20, %v28_v15  ;;  %v36_v28 = vrot.slane %v35_v21, 2  ;;  %v44_v29 = vadd.f32 %v43_v25, %v42_v18  ;;  %v50_v30 = vrot.slane %v49_v26, 2 }
  0x10   :  { %v31_v31 = vrot.slane %v30_v27, 1  ;;  %v37_v32 = vadd.f32 %v36_v28, %v35_v21  ;;  %v45_v35 = vrot.slane %v44_v29, 1  ;;  %v51_v36 = vadd.f32 %v50_v30, %v49_v26 }
  0x12   :  { %v32_v37 = vadd.f32 %v31_v31, %v30_v27  ;;  %v38_v38 = vrot.slane %v37_v32, 1  ;;  %v46_v39 = vadd.f32 %v45_v35, %v44_v29  ;;  %v52_v40 = vrot.slane %v51_v36, 1 }
  0x14   :  { %v39_v41 = vadd.f32 %v38_v38, %v37_v32  ;;  %v53_v43 = vadd.f32 %v52_v40, %v51_v36 }
  0x16   :  { %v58_v44 = vcombine.low %v32_v37, %v39_v41  ;;  %v59_v45 = vcombine.low %v46_v39, %v53_v43 }
  0x18   :  { %v66_v46 = vrot.slane %v58_v44, %v65_v42  ;;  %v73_v47 = vrot.slane %v59_v45, %v65_v42 }
  0x1a   :  { %v74_v48 = vcombine.low %v66_v46, %v73_v47 }
  0x1c   :  { %v81_v49 = vrot.slane %v74_v48, %v65_v42 }
  0x1e   :  { %87 = vst.msk [vmem:[%s126_s2] sm:$0xf] %vm85_vm1, %v81_v49 }

// kernel: vae_loss.2
= control target key start
LH: loop header
LB: loop body
LE: loop exit
PB: predicated region body
PF: predicated region fallthrough
CT: control target
= control target key end

     0   :  { %s111_s0 = inlined_call_operand.vmem [shape: f32[1,64], index: 0, kind: input, shape index: {}]   ;;  %s112_s1 = inlined_call_operand.vmem [shape: f32[1,64], index: 1, kind: input, shape index: {}]   ;;  %s113_s2 = inlined_call_operand.hbm [shape: f32[1,128], index: 2, kind: output, shape index: {}]  }
   0x1   :  { %v13_v0 = vld [vmem:[%s112_s1] sm:$0x1] }
   0x2   :  { %v17_v1 = vmul.f32 1.442695, %v13_v0 }
   0x3   :  { %7 = vsyncpa [#allocation3], 0  ;;  %v12_v2 = vld [vmem:[%s111_s0] sm:$0x1]  ;;  %v14_v3 = vadd.f32 1.0, %v13_v0  ;;  %vm20_vm0 = vcmask 516096  }
   0x4   :  { %51 = vpow2.f32 %v17_v1  ;;  %v15_v4 = vmul.f32 %v12_v2, %v12_v2  ;;  %s77_s1 = smov [#allocation2]  }
   0x5   :  { %s40_s13 = sshll.u32 %s77_s1, 4  ;;  %s41_s13 = int_to_ptr.vmem [resolvable:$true] %s40_s13 }
   0x6   :  { %v16_v5 = vsub.f32 %v14_v3, %v15_v4  ;;  %s53_s15 = scalar_lea.vmem %s41_s13, 16  ;;  %s57_s16 = scalar_lea.vmem %s41_s13, 32 }
   0x7   :  { %p54_p0 = scmp.ne.s32.totalorder %s41_s13, %s53_s15  ;;  %p58_p1 = scmp.lt.s32.totalorder %s41_s13, %s41_s13 }
   0x8   :  { %p59_p2 = scmp.lt.s32.totalorder %s57_s16, %s53_s15 }
   0xa   :  { %p60_p3 = por %p59_p2, %p58_p1 }
   0xc   :  { %p61_p4 = pnand %p60_p3, %p54_p0 }
   0xe   :  { %v52_v6 = vpop.eup %51 }
   0xf   :  { %v19_v7 = vsub.f32 %v16_v5, %v52_v6 }
  0x11   :  { %v21_v8 = vsel %vm20_vm0, %v19_v7, 0.0 }
  0x12   :  { %22 = vadd.xlane.f32.xlu0 %v21_v8 }
  0x9f   :  { %v23_v9 = vpop.xlane.xlu0 %22 }
  0xa0   :  { %v24_v10 = vrot.slane %v23_v9, 4 }
  0xa2   :  { %v25_v11 = vadd.f32 %v24_v10, %v23_v9 }
  0xa4   :  { %v26_v12 = vrot.slane %v25_v11, 2 }
  0xa6   :  { %v27_v13 = vadd.f32 %v26_v12, %v25_v11 }
  0xa8   :  { %v28_v14 = vrot.slane %v27_v13, 1 }
  0xaa   :  { %v29_v15 = vadd.f32 %v28_v14, %v27_v13 }
  0xac   :  { %48 = vpush %v29_v15 }
  0xdd   :  { %s49_s0 = spop %48 }
  0xde   :  { %s31_s14 = smul.f32 -0.5, %s49_s0 }
  0xe0   :  { %v32_v16 = vstv %s31_s14 }
  0xe1   :  { %33 = vst [vmem:[#allocation2] sm:$0x1] %v32_v16 }
  0xe2   :  { %64 = shalt.err (!%p61_p4)
}
  0xe3   :  { %s65_s19 = scalar_lea.hbm %s113_s2, 16 }
  0xe4   :  { %p66_p5 = scmp.ne.s32.totalorder %s113_s2, %s65_s19  ;;  %p69_p6 = scmp.lt.u32.totalorder %s65_s19, %s113_s2 }
  0xe6   :  { %p71_p7 = pnand %p69_p6, %p66_p5 }
  0xe8   :  { %74 = shalt.err (!%p71_p7)
}
  0xe9   :  { %43 = dma.vmem_to_hbm [thread:$0]  %s41_s13, 16, %s113_s2, [#allocation3]  }
  0xea   :  { %75 = dma.done.wait [#allocation3], 16  }
  0xeb   :  { %76 = vsyncadd [#allocation3], 4294967280 }
  0xec   :  { %47 = vsyncpa [#allocation3], 1 }

</bundles_post_ra>
